<compile_context>
chip_gen: v5e
topology: v5e:2x2
jax: 0.10.0
libtpu: 0.0.40
codegen_flags: <defaults>
</compile_context>

<pallas_src>
import jax
import jax.numpy as jnp
from jax.experimental import pallas as pl
from jax.experimental.pallas import tpu as pltpu

_MAX_K_CHUNK = 4096          # layer-1 contraction chunk (multiple of 128)
_MAX_BATCH_TILE = 512        # batch tile cap (multiple of 8)
_HID1 = 128                  # layer-1 width (lane aligned)
_HID2_PAD = 128              # layer-2 width padded 64 -> 128
_OUT_PAD = 128               # layer-3 width padded 1 -> 128
_W1_RESIDENT_BYTES = 12 * 1024 * 1024   # pin w1 in VMEM below this (bf16 bytes)
_VMEM_LIMIT = 48 * 1024 * 1024          # fits v5e/v6e (128 MiB) and v7x (64 MiB)


def _round_up(v, m):
    return ((v + m - 1) // m) * m


def _cdiv(a, b):
    return -(-a // b)


def _pad_k(d):
    """(padded length, chunk size) for the layer-1 contraction dimension."""
    d128 = _round_up(d, 128)
    nk = _cdiv(d128, _MAX_K_CHUNK)
    dk = _round_up(_cdiv(d128, nk), 128)
    return nk * dk, dk


def _pick_batch_tile(b):
    """Batch tile (multiple of 8, <= cap) minimizing padded-row waste; among
    equal-waste candidates prefer >=2 tiles (v7x megacore) then the largest."""
    b8 = _round_up(b, 8)
    best_key, best_tb = None, 8
    for tb in range(8, min(_MAX_BATCH_TILE, b8) + 1, 8):
        b_pad = _round_up(b8, tb)
        key = (b_pad - b, 0 if b_pad // tb >= 2 else 1, -tb)
        if best_key is None or key < best_key:
            best_key, best_tb = key, tb
    return best_tb


def _make_kernel(nk, dk, w1_resident):
    last = nk - 1

    def kernel(in_ref, w1_ref, b1_ref, w2_ref, b2_ref, w3_ref, b3_ref,
               out_ref, acc_ref):
        k = pl.program_id(1)

        @pl.when(k == 0)
        def _init():
            acc_ref[...] = jnp.zeros_like(acc_ref)

        if w1_resident:
            # Full w1 pinned in VMEM; slice the current K chunk in-kernel.
            start = pl.multiple_of(k * dk, dk)
            w1_blk = w1_ref[pl.ds(start, dk), :]
        else:
            w1_blk = w1_ref[...]

        # Layer-1 partial: bf16 MXU matmul, f32 accumulation in VMEM scratch.
        acc_ref[...] += jnp.dot(in_ref[...], w1_blk,
                                preferred_element_type=jnp.float32)

        # Finalize: bias + ReLU, layers 2/3, lane-dense (tb,128) store.
        @pl.when(k == last)
        def _finalize():
            h1 = jnp.maximum(acc_ref[...] + b1_ref[...], 0.0)
            h2 = jnp.dot(h1.astype(jnp.bfloat16), w2_ref[...],
                         preferred_element_type=jnp.float32) + b2_ref[...]
            h2 = jnp.maximum(h2, 0.0)
            out = jnp.dot(h2.astype(jnp.bfloat16), w3_ref[...],
                          preferred_element_type=jnp.float32) + b3_ref[...]
            out_ref[...] = out.astype(out_ref.dtype)

    return kernel


def discriminator_forward(x, adj, params, *, batch_tile=None):
    """x: (B, N, F), adj: (B, N, N) -> (B, 1) float32."""
    b, n, f = x.shape
    d_x, d_adj = n * f, n * n
    d = d_x + d_adj
    w1, b1, w2, b2, w3, b3 = params

    d_pad, dk = _pad_k(d)
    assert w1.shape[0] == d_pad, "params were padded for a different (N, F)"
    nk = d_pad // dk

    tb = batch_tile if batch_tile is not None else _pick_batch_tile(b)
    b_pad = _round_up(b, tb)

    # Single merged bf16 stream [x_flat | adj_flat]; cast BEFORE any pad so the
    # wrapper-side materialization moves half the bytes.  Skip the pad when the
    # shapes already line up.
    inp = jnp.concatenate(
        [x.reshape(b, d_x).astype(jnp.bfloat16),
         adj.reshape(b, d_adj).astype(jnp.bfloat16)], axis=1)
    if (b_pad, d_pad) != (b, d):
        inp = jnp.pad(inp, ((0, b_pad - b), (0, d_pad - d)))

    # Pin w1 fully VMEM-resident when small enough; otherwise stream K chunks.
    w1_resident = (nk > 1) and (d_pad * _HID1 * 2 <= _W1_RESIDENT_BYTES)
    if w1_resident:
        w1_spec = pl.BlockSpec((d_pad, _HID1), lambda i, k: (0, 0))
    else:
        w1_spec = pl.BlockSpec((dk, _HID1), lambda i, k: (k, 0))

    const = lambda i, k: (0, 0)
    out = pl.pallas_call(
        _make_kernel(nk, dk, w1_resident),
        out_shape=jax.ShapeDtypeStruct((b_pad, _OUT_PAD), jnp.float32),
        grid=(b_pad // tb, nk),
        in_specs=[
            pl.BlockSpec((tb, dk), lambda i, k: (i, k)),   # merged x|adj (bf16)
            w1_spec,                                       # w1 (resident/stream)
            pl.BlockSpec((1, _HID1), const),               # b1
            pl.BlockSpec((_HID1, _HID2_PAD), const),       # w2 (VMEM resident)
            pl.BlockSpec((1, _HID2_PAD), const),           # b2
            pl.BlockSpec((_HID2_PAD, _OUT_PAD), const),    # w3 (VMEM resident)
            pl.BlockSpec((1, _OUT_PAD), const),            # b3
        ],
        out_specs=pl.BlockSpec((tb, _OUT_PAD), lambda i, k: (i, 0)),
        scratch_shapes=[pltpu.VMEM((tb, _HID1), jnp.float32)],
        compiler_params=pltpu.CompilerParams(
            dimension_semantics=("parallel", "arbitrary"),
            vmem_limit_bytes=_VMEM_LIMIT),
    )(inp, w1, b1, w2, b2, w3, b3)

    return out[:b, :1]


def init_params(key, num_nodes, node_features):
    """nn.Linear-style init; weights stored (in,out), bf16, zero-padded."""
    d_x = num_nodes * node_features
    d_adj = num_nodes * num_nodes
    input_dim = d_x + d_adj
    d_pad, _ = _pad_k(input_dim)

    def uni(k, shape, fan_in):
        bound = 1.0 / (fan_in ** 0.5)
        return jax.random.uniform(k, shape, jnp.float32, -bound, bound)

    k1w, k1b, k2w, k2b, k3w, k3b = jax.random.split(key, 6)

    # Layer 1: logical (input_dim, 128), zero-padded rows to (d_pad, 128).
    w1r = uni(k1w, (input_dim, _HID1), input_dim)
    b1 = uni(k1b, (1, _HID1), input_dim)
    w1 = jnp.zeros((d_pad, _HID1), jnp.float32).at[:input_dim].set(w1r)

    # Layer 2: logical (128, 64), zero-padded to (128, 128).
    w2r = uni(k2w, (_HID1, 64), _HID1)
    b2r = uni(k2b, (1, 64), _HID1)
    w2 = jnp.zeros((_HID1, _HID2_PAD), jnp.float32).at[:, :64].set(w2r)
    b2 = jnp.zeros((1, _HID2_PAD), jnp.float32).at[:, :64].set(b2r)

    # Layer 3: logical (64, 1), zero-padded to (128, 128); only column 0 real.
    w3r = uni(k3w, (64, 1), 64)
    b3r = uni(k3b, (1, 1), 64)
    w3 = jnp.zeros((_HID2_PAD, _OUT_PAD), jnp.float32).at[:64, :1].set(w3r)
    b3 = jnp.zeros((1, _OUT_PAD), jnp.float32).at[:, :1].set(b3r)

    return (w1.astype(jnp.bfloat16), b1, w2.astype(jnp.bfloat16), b2,
            w3.astype(jnp.bfloat16), b3)


def reference_forward_bf16(x, adj, params):
    """Pure-JAX reference matching the kernel's bf16-matmul/f32-acc numerics."""
    w1, b1, w2, b2, w3, b3 = params
    b, n, f = x.shape
    d = n * f + n * n
    inp = jnp.concatenate([x.reshape(b, -1), adj.reshape(b, -1)],
                          axis=1).astype(jnp.bfloat16)
    h1 = jnp.maximum(jnp.dot(inp, w1[:d], preferred_element_type=jnp.float32)
                     + b1, 0.0)
    h2 = jnp.maximum(jnp.dot(h1.astype(jnp.bfloat16), w2,
                             preferred_element_type=jnp.float32) + b2, 0.0)
    out = jnp.dot(h2.astype(jnp.bfloat16), w3,
                  preferred_element_type=jnp.float32) + b3
    return out[:, :1]


def reference_forward_f32(x, adj, params):
    """Full-f32 reference (true Discriminator math with the stored weights)."""
    w1, b1, w2, b2, w3, b3 = params
    b, n, f = x.shape
    d = n * f + n * n
    inp = jnp.concatenate([x.reshape(b, -1), adj.reshape(b, -1)],
                          axis=1).astype(jnp.float32)
    h1 = jnp.maximum(inp @ w1[:d].astype(jnp.float32) + b1, 0.0)
    h2 = jnp.maximum(h1 @ w2.astype(jnp.float32) + b2, 0.0)
    out = h2 @ w3.astype(jnp.float32) + b3
    return out[:, :1]


def _run_case(batch, num_nodes, node_features, seed):
    key = jax.random.PRNGKey(seed)
    kx, kadj, kparam = jax.random.split(key, 3)
    x = jax.random.normal(kx, (batch, num_nodes, node_features), jnp.float32)
    adj = jax.random.uniform(kadj, (batch, num_nodes, num_nodes), jnp.float32)
    params = init_params(kparam, num_nodes, node_features)

    out = jax.block_until_ready(discriminator_forward(x, adj, params))
    assert out.shape == (batch, 1), out.shape

    ref16 = reference_forward_bf16(x, adj, params)
    ref32 = reference_forward_f32(x, adj, params)
    assert jnp.allclose(out, ref16, atol=1e-2, rtol=1e-2)
    assert jnp.allclose(out, ref32, atol=3e-2, rtol=3e-2)


if __name__ == "__main__":
    # Small case from the spec: single K chunk, single batch tile.
    _run_case(batch=2, num_nodes=8, node_features=4, seed=0)
    # Larger case: exercises multi-chunk K reduction, resident-w1 in-kernel
    # slicing, multiple batch tiles, and batch/K padding paths.
    _run_case(batch=20, num_nodes=72, node_features=8, seed=1)
    print("KERNEL_OK")
</pallas_src>

<mosaic_0001>
module attributes {stable_mosaic.version = 11 : i64} {
  func.func @kernel(%arg0: i32, %arg1: i32, %arg2: memref<8x128xbf16, #tpu.memory_space<vmem>>, %arg3: memref<128x128xbf16, #tpu.memory_space<vmem>>, %arg4: memref<1x128xf32, #tpu.memory_space<vmem>>, %arg5: memref<128x128xbf16, #tpu.memory_space<vmem>>, %arg6: memref<1x128xf32, #tpu.memory_space<vmem>>, %arg7: memref<128x128xbf16, #tpu.memory_space<vmem>>, %arg8: memref<1x128xf32, #tpu.memory_space<vmem>>, %arg9: memref<8x128xf32, #tpu.memory_space<vmem>>, %arg10: memref<8x128xf32, #tpu.memory_space<vmem>>) attributes {dimension_semantics = [#tpu.dimension_semantics<parallel>, #tpu.dimension_semantics<arbitrary>], iteration_bounds = array<i64: 1, 1>, scalar_prefetch = 0 : i64, scratch_operands = 1 : i64, tpu.core_type = #tpu.core_type<tc>, window_params = [{transform_indices = @transform_0, window_bounds = array<i64: 8, 128>}, {transform_indices = @transform_1, window_bounds = array<i64: 128, 128>}, {pipeline_mode = #tpu.pipeline_mode<synchronous>, transform_indices = @transform_2, window_bounds = array<i64: 1, 128>}, {pipeline_mode = #tpu.pipeline_mode<synchronous>, transform_indices = @transform_3, window_bounds = array<i64: 128, 128>}, {pipeline_mode = #tpu.pipeline_mode<synchronous>, transform_indices = @transform_4, window_bounds = array<i64: 1, 128>}, {pipeline_mode = #tpu.pipeline_mode<synchronous>, transform_indices = @transform_5, window_bounds = array<i64: 128, 128>}, {pipeline_mode = #tpu.pipeline_mode<synchronous>, transform_indices = @transform_6, window_bounds = array<i64: 1, 128>}, {transform_indices = @transform_7, window_bounds = array<i64: 8, 128>}]} {
    %c0_i32 = arith.constant 0 : i32
    %0 = arith.cmpi eq, %arg1, %c0_i32 : i32
    %1 = arith.extui %0 : i1 to i32
    %c0_i32_0 = arith.constant 0 : i32
    %2 = arith.cmpi ne, %1, %c0_i32_0 : i32
    scf.if %2 {
      %cst_10 = arith.constant 0.000000e+00 : f32
      %12 = vector.broadcast %cst_10 : f32 to vector<8x128xf32>
      %c0_11 = arith.constant 0 : index
      %c0_12 = arith.constant 0 : index
      %13 = vector.load %arg10[%c0_11, %c0_12] : memref<8x128xf32, #tpu.memory_space<vmem>>, vector<8x128xf32>
      tpu.vector_store %arg10[%c0_11, %c0_12], %12 {strides = array<i32>} : memref<8x128xf32, #tpu.memory_space<vmem>>, vector<8x128xf32>,
    } else {
    }
    %c0 = arith.constant 0 : index
    %c0_1 = arith.constant 0 : index
    %3 = vector.load %arg3[%c0, %c0_1] : memref<128x128xbf16, #tpu.memory_space<vmem>>, vector<128x128xbf16>
    %c0_2 = arith.constant 0 : index
    %c0_3 = arith.constant 0 : index
    %4 = vector.load %arg10[%c0_2, %c0_3] : memref<8x128xf32, #tpu.memory_space<vmem>>, vector<8x128xf32>
    %c0_4 = arith.constant 0 : index
    %c0_5 = arith.constant 0 : index
    %5 = vector.load %arg2[%c0_4, %c0_5] : memref<8x128xbf16, #tpu.memory_space<vmem>>, vector<8x128xbf16>
    %cst = arith.constant dense<0.000000e+00> : vector<8x128xf32>
    %6 = tpu.matmul %5, %3, %cst {dimension_numbers = #tpu.dot_dimension_numbers<[1], [0], [0], [1], [0, 0, 1, 1], [], []>} : vector<8x128xbf16>, vector<128x128xbf16>, vector<8x128xf32> -> vector<8x128xf32>
    %7 = arith.addf %4, %6 : vector<8x128xf32>
    %c0_6 = arith.constant 0 : index
    %c0_7 = arith.constant 0 : index
    %8 = vector.load %arg10[%c0_6, %c0_7] : memref<8x128xf32, #tpu.memory_space<vmem>>, vector<8x128xf32>
    tpu.vector_store %arg10[%c0_6, %c0_7], %7 {strides = array<i32>} : memref<8x128xf32, #tpu.memory_space<vmem>>, vector<8x128xf32>,
    %c0_i32_8 = arith.constant 0 : i32
    %9 = arith.cmpi eq, %arg1, %c0_i32_8 : i32
    %10 = arith.extui %9 : i1 to i32
    %c0_i32_9 = arith.constant 0 : i32
    %11 = arith.cmpi ne, %10, %c0_i32_9 : i32
    scf.if %11 {
      %c0_10 = arith.constant 0 : index
      %c0_11 = arith.constant 0 : index
      %12 = vector.load %arg10[%c0_10, %c0_11] : memref<8x128xf32, #tpu.memory_space<vmem>>, vector<8x128xf32>
      %c0_12 = arith.constant 0 : index
      %c0_13 = arith.constant 0 : index
      %13 = vector.load %arg4[%c0_12, %c0_13] : memref<1x128xf32, #tpu.memory_space<vmem>>, vector<1x128xf32>
      %14 = vector.broadcast %13 : vector<1x128xf32> to vector<8x128xf32>
      %15 = arith.addf %12, %14 : vector<8x128xf32>
      %cst_14 = arith.constant 0.000000e+00 : f32
      %16 = vector.broadcast %cst_14 : f32 to vector<8x128xf32>
      %17 = arith.maximumf %15, %16 : vector<8x128xf32>
      %18 = arith.truncf %17 : vector<8x128xf32> to vector<8x128xbf16>
      %c0_15 = arith.constant 0 : index
      %c0_16 = arith.constant 0 : index
      %19 = vector.load %arg5[%c0_15, %c0_16] : memref<128x128xbf16, #tpu.memory_space<vmem>>, vector<128x128xbf16>
      %cst_17 = arith.constant dense<0.000000e+00> : vector<8x128xf32>
      %20 = tpu.matmul %18, %19, %cst_17 {dimension_numbers = #tpu.dot_dimension_numbers<[1], [0], [0], [1], [0, 0, 1, 1], [], []>} : vector<8x128xbf16>, vector<128x128xbf16>, vector<8x128xf32> -> vector<8x128xf32>
      %c0_18 = arith.constant 0 : index
      %c0_19 = arith.constant 0 : index
      %21 = vector.load %arg6[%c0_18, %c0_19] : memref<1x128xf32, #tpu.memory_space<vmem>>, vector<1x128xf32>
      %22 = vector.broadcast %21 : vector<1x128xf32> to vector<8x128xf32>
      %23 = arith.addf %20, %22 : vector<8x128xf32>
      %cst_20 = arith.constant 0.000000e+00 : f32
      %24 = vector.broadcast %cst_20 : f32 to vector<8x128xf32>
      %25 = arith.maximumf %23, %24 : vector<8x128xf32>
      %26 = arith.truncf %25 : vector<8x128xf32> to vector<8x128xbf16>
      %c0_21 = arith.constant 0 : index
      %c0_22 = arith.constant 0 : index
      %27 = vector.load %arg7[%c0_21, %c0_22] : memref<128x128xbf16, #tpu.memory_space<vmem>>, vector<128x128xbf16>
      %cst_23 = arith.constant dense<0.000000e+00> : vector<8x128xf32>
      %28 = tpu.matmul %26, %27, %cst_23 {dimension_numbers = #tpu.dot_dimension_numbers<[1], [0], [0], [1], [0, 0, 1, 1], [], []>} : vector<8x128xbf16>, vector<128x128xbf16>, vector<8x128xf32> -> vector<8x128xf32>
      %c0_24 = arith.constant 0 : index
      %c0_25 = arith.constant 0 : index
      %29 = vector.load %arg8[%c0_24, %c0_25] : memref<1x128xf32, #tpu.memory_space<vmem>>, vector<1x128xf32>
      %30 = vector.broadcast %29 : vector<1x128xf32> to vector<8x128xf32>
      %31 = arith.addf %28, %30 : vector<8x128xf32>
      %c0_26 = arith.constant 0 : index
      %c0_27 = arith.constant 0 : index
      %32 = vector.load %arg9[%c0_26, %c0_27] : memref<8x128xf32, #tpu.memory_space<vmem>>, vector<8x128xf32>
      tpu.vector_store %arg9[%c0_26, %c0_27], %31 {strides = array<i32>} : memref<8x128xf32, #tpu.memory_space<vmem>>, vector<8x128xf32>,
    } else {
    }
    return
  }
  func.func @transform_0(%arg0: i32, %arg1: i32) -> (i32, i32) {
    %c0_i32 = arith.constant 0 : i32
    return %arg0, %arg1 : i32, i32
  }
  func.func @transform_1(%arg0: i32, %arg1: i32) -> (i32, i32) {
    %c0_i32 = arith.constant 0 : i32
    %c0_i32_0 = arith.constant 0 : i32
    return %arg1, %c0_i32 : i32, i32
  }
  func.func @transform_2(%arg0: i32, %arg1: i32) -> (i32, i32) {
    %c0_i32 = arith.constant 0 : i32
    %c0_i32_0 = arith.constant 0 : i32
    %c0_i32_1 = arith.constant 0 : i32
    return %c0_i32, %c0_i32_0 : i32, i32
  }
  func.func @transform_3(%arg0: i32, %arg1: i32) -> (i32, i32) {
    %c0_i32 = arith.constant 0 : i32
    %c0_i32_0 = arith.constant 0 : i32
    %c0_i32_1 = arith.constant 0 : i32
    return %c0_i32, %c0_i32_0 : i32, i32
  }
  func.func @transform_4(%arg0: i32, %arg1: i32) -> (i32, i32) {
    %c0_i32 = arith.constant 0 : i32
    %c0_i32_0 = arith.constant 0 : i32
    %c0_i32_1 = arith.constant 0 : i32
    return %c0_i32, %c0_i32_0 : i32, i32
  }
  func.func @transform_5(%arg0: i32, %arg1: i32) -> (i32, i32) {
    %c0_i32 = arith.constant 0 : i32
    %c0_i32_0 = arith.constant 0 : i32
    %c0_i32_1 = arith.constant 0 : i32
    return %c0_i32, %c0_i32_0 : i32, i32
  }
  func.func @transform_6(%arg0: i32, %arg1: i32) -> (i32, i32) {
    %c0_i32 = arith.constant 0 : i32
    %c0_i32_0 = arith.constant 0 : i32
    %c0_i32_1 = arith.constant 0 : i32
    return %c0_i32, %c0_i32_0 : i32, i32
  }
  func.func @transform_7(%arg0: i32, %arg1: i32) -> (i32, i32) {
    %c0_i32 = arith.constant 0 : i32
    %c0_i32_0 = arith.constant 0 : i32
    return %arg0, %c0_i32 : i32, i32
  }
}

</mosaic_0001>

<bundles_post_ra>
// kernel: tpu_custom_call.1
= control target key start
LH: loop header
LB: loop body
LE: loop exit
PB: predicated region body
PF: predicated region fallthrough
CT: control target
= control target key end

     0   :  { %12 = vsyncpa [#allocation4], 0  ;;  %s698_s0 = inlined_call_operand.hbm [shape: bf16[8,128], index: 0, kind: input, shape index: {}]   ;;  %s699_s1 = inlined_call_operand.hbm [shape: bf16[128,128], index: 1, kind: input, shape index: {}]   ;;  %s700_s2 = inlined_call_operand.vmem [shape: f32[1,128], index: 2, kind: input, shape index: {}]   ;;  %s701_s3 = inlined_call_operand.hbm [shape: bf16[128,128], index: 3, kind: input, shape index: {}]   ;;  %s702_s4 = inlined_call_operand.vmem [shape: f32[1,128], index: 4, kind: input, shape index: {}]   ;;  %s703_s5 = inlined_call_operand.hbm [shape: bf16[128,128], index: 5, kind: input, shape index: {}]   ;;  %s704_s6 = inlined_call_operand.vmem [shape: f32[1,128], index: 6, kind: input, shape index: {}]   ;;  %s705_s7 = inlined_call_operand.hbm [shape: f32[8,128], index: 7, kind: output, shape index: {}]  }
   0x1   :  { %13 = vsyncpa [#allocation7], 0 }
   0x2   :  { %14 = vsyncpa [#allocation10], 0  ;;  %s31_s26 = sshll.u32 %s699_s1, 4  ;;  %s32_s26 = int_to_ptr.hbm [resolvable:$true] %s31_s26 }
   0x3   :  { %15 = vsyncpa [#allocation5], 0  ;;  %s627_s27 = smov [#allocation6]   ;;  %s21_s8 = sshll.u32 %s698_s0, 4  ;;  %s22_s8 = int_to_ptr.hbm [resolvable:$true] %s21_s8 }
   0x4   :  { %s33_s28 = sshll.u32 %s627_s27, 4  ;;  %s628_s9 = smov 64   ;;  %s34_s28 = int_to_ptr.vmem [resolvable:$true] %s33_s28 }
   0x5   :  { %s629_s10 = smov 4   ;;  %s630_s11 = smov [#allocation3]  }
   0x6   :  { %39 = dma.hbm_to_vmem [thread:$0]  %s32_s26, 1024, %s34_s28, [#allocation7], %s628_s9, %s628_s9, %s629_s10  }
   0x7   :  { %s23_s12 = sshll.u32 %s630_s11, 4  ;;  %s46_s15 = sshll.u32 %s701_s3, 4  ;;  %s24_s12 = int_to_ptr.vmem [resolvable:$true] %s23_s12  ;;  %s47_s15 = int_to_ptr.hbm [resolvable:$true] %s46_s15 }
   0x8   :  { %26 = dma.hbm_to_vmem [thread:$0]  %s22_s8, 64, %s24_s12, [#allocation4]  }
   0x9   :  { %s61_s17 = sshll.u32 %s703_s5, 4  ;;  %s631_s18 = smov [#allocation8]   ;;  %s62_s17 = int_to_ptr.hbm [resolvable:$true] %s61_s17 }
   0xa   :  { %s48_s19 = sshll.u32 %s631_s18, 4  ;;  %s632_s0 = smov [#allocation9]   ;;  %s49_s19 = int_to_ptr.vmem [resolvable:$true] %s48_s19 }
   0xb   :  { %54 = dma.hbm_to_vmem [thread:$0]  %s47_s15, 1024, %s49_s19, [#allocation7], %s628_s9, %s628_s9, %s629_s10  }
   0xc   :  { %s63_s20 = sshll.u32 %s632_s0, 4  ;;  %s64_s20 = int_to_ptr.vmem [resolvable:$true] %s63_s20 }
   0xd   :  { %69 = dma.hbm_to_vmem [thread:$0]  %s62_s17, 1024, %s64_s20, [#allocation10], %s628_s9, %s628_s9, %s629_s10  }
   0xe   :  { %619 = dma.done.wait [#allocation4], 64  }
   0xf   :  { %620 = vsyncadd [#allocation4], 4294967232 }
  0x10   :  { %621 = dma.done.wait [#allocation7], 2048  }
  0x11   :  { %622 = vsyncadd [#allocation7], 4294965248 }
  0x12   :  { %623 = dma.done.wait [#allocation10], 1024  }
  0x13   :  { %624 = vsyncadd [#allocation10], 4294966272  ;;  %v472_v0 = vld [vmem:[#allocation6 + $0x38] sm:$0xff]  ;;  %v471_v1 = vld [vmem:[#allocation6 + $0x30] sm:$0xff]  ;;  %s633_s24 = smov [#allocation11]   ;;  %s357_s28 = sshll.u32 %s705_s7, 4  ;;  %s358_s28 = int_to_ptr.hbm [resolvable:$true] %s357_s28 }
  0x14   :  { %159 = vmatpush.bf16.msra.mxu0 %v472_v0  ;;  %v480_v2 = vld [vmem:[#allocation8 + $0x38] sm:$0xff]  ;;  %v479_v3 = vld [vmem:[#allocation8 + $0x30] sm:$0xff]  ;;  %v470_v4 = vld [vmem:[#allocation6 + $0x28] sm:$0xff]  ;;  %s355_s25 = sshll.u32 %s633_s24, 4  ;;  %s356_s25 = int_to_ptr.vmem [resolvable:$true] %s355_s25 }
  0x15   :  { %253 = vmatpush.bf16.msra.mxu1 %v480_v2  ;;  %v478_v5 = vld [vmem:[#allocation8 + $0x28] sm:$0xff]  ;;  %v469_v6 = vld [vmem:[#allocation6 + $0x20] sm:$0xff]  ;;  %v468_v8 = vld [vmem:[#allocation6 + $0x18] sm:$0xff] }
  0x16   :  { %v477_v7 = vld [vmem:[#allocation8 + $0x20] sm:$0xff]  ;;  %v476_v9 = vld [vmem:[#allocation8 + $0x18] sm:$0xff]  ;;  %v467_v10 = vld [vmem:[#allocation6 + $0x10] sm:$0xff] }
  0x17   :  { %v475_v11 = vld [vmem:[#allocation8 + $0x10] sm:$0xff]  ;;  %v466_v12 = vld [vmem:[#allocation6 + $0x8] sm:$0xff]  ;;  %v465_v13 = vld [vmem:[#allocation6] sm:$0xff] }
  0x18   :  { %160 = vmatpush.bf16.msra.mxu0 %v471_v1  ;;  %v110_v14 = vld [vmem:[#allocation3] sm:$0xf]  ;;  %v474_v15 = vld [vmem:[#allocation8 + $0x8] sm:$0xff]  ;;  %v473_v16 = vld [vmem:[#allocation8] sm:$0xff] }
  0x19   :  { %254 = vmatpush.bf16.msra.mxu1 %v479_v3  ;;  %v488_v17 = vld [vmem:[#allocation9 + $0x38] sm:$0xff]  ;;  %v487_v18 = vld [vmem:[#allocation9 + $0x30] sm:$0xff]  ;;  %v486_v19 = vld [vmem:[#allocation9 + $0x28] sm:$0xff] }
  0x1a   :  { %336 = vmatpush.bf16.msra.mxu2 %v488_v17  ;;  %v485_v20 = vld [vmem:[#allocation9 + $0x20] sm:$0xff]  ;;  %v484_v21 = vld [vmem:[#allocation9 + $0x18] sm:$0xff]  ;;  %v483_v22 = vld [vmem:[#allocation9 + $0x10] sm:$0xff] }
  0x1b   :  { %v496_v23 = vld [vmem:[%s700_s2] ss:$0 sm:$0xff]  ;;  %v482_v29 = vld [vmem:[#allocation9 + $0x8] sm:$0xff]  ;;  %v481_v30 = vld [vmem:[#allocation9] sm:$0xff] }
  0x1c   :  { %161 = vmatpush.bf16.msra.mxu0 %v470_v4  ;;  %v497_v31 = vld [vmem:[%s702_s4] ss:$0 sm:$0xff] }
  0x1d   :  { %255 = vmatpush.bf16.msra.mxu1 %v478_v5  ;;  %v498_v37 = vld [vmem:[%s704_s6] ss:$0 sm:$0xff] }
  0x1e   :  { %337 = vmatpush.bf16.msra.mxu2 %v487_v18 }
  0x20   :  { %162 = vmatpush.bf16.msra.mxu0 %v469_v6 }
  0x21   :  { %256 = vmatpush.bf16.msra.mxu1 %v477_v7 }
  0x22   :  { %338 = vmatpush.bf16.msra.mxu2 %v486_v19 }
  0x24   :  { %163 = vmatpush.bf16.msra.mxu0 %v468_v8 }
  0x25   :  { %257 = vmatpush.bf16.msra.mxu1 %v476_v9 }
  0x26   :  { %339 = vmatpush.bf16.msra.mxu2 %v485_v20 }
  0x28   :  { %164 = vmatpush.bf16.msra.mxu0 %v467_v10 }
  0x29   :  { %258 = vmatpush.bf16.msra.mxu1 %v475_v11 }
  0x2a   :  { %340 = vmatpush.bf16.msra.mxu2 %v484_v21 }
  0x2c   :  { %165 = vmatpush.bf16.msra.mxu0 %v466_v12 }
  0x2d   :  { %259 = vmatpush.bf16.msra.mxu1 %v474_v15 }
  0x2e   :  { %341 = vmatpush.bf16.msra.mxu2 %v483_v22 }
  0x30   :  { %166 = vmatpush.bf16.msra.mxu0 %v465_v13 }
  0x31   :  { %260 = vmatpush.bf16.msra.mxu1 %v473_v16 }
  0x32   :  { %342 = vmatpush.bf16.msra.mxu2 %v482_v29 }
  0x33   :  { %167 = vmatmul.bf16.vlgmr.msra.gmra.mxu0 %v110_v14 }
  0x36   :  { %343 = vmatpush.bf16.msra.mxu2 %v481_v30 }
  0xb0   :  { %v168_v24 = vpop.f32.mrf.mxu0 }
  0xb1   :  { %v182_v25 = vadd.f32 %v496_v23, %v168_v24 }
  0xb3   :  { %v183_v26 = vmax.f32 %v182_v25, 0.0 }
  0xb5   :  { %v184_v27 = vpack.c.bf16 %v183_v26, %v183_v26 }
  0xb7   :  { %261 = vmatmul.bf16.vlgmr.msra.gmra.mxu1 %v184_v27 }
  0xb8   :  { %v170_v28 = vpop.f32.mrf.mxu0 }
 0x134   :  { %v262_v32 = vpop.f32.mrf.mxu1 }
 0x135   :  { %v263_v33 = vadd.f32 %v497_v31, %v262_v32 }
 0x137   :  { %v266_v34 = vmax.f32 %v263_v33, 0.0 }
 0x139   :  { %v267_v35 = vpack.c.bf16 %v266_v34, %v266_v34 }
 0x13b   :  { %344 = vmatmul.bf16.vlgmr.msra.gmra.mxu2 %v267_v35 }
 0x13c   :  { %v264_v36 = vpop.f32.mrf.mxu1 }
 0x1be   :  { %v345_v38 = vpop.f32.mrf.mxu2 }
 0x1bf   :  { %v346_v39 = vadd.f32 %v498_v37, %v345_v38 }
 0x1c1   :  { %349 = vst [vmem:[#allocation11] sm:$0xff] %v346_v39 }
 0x1c2   :  { %360 = dma.vmem_to_hbm [thread:$0]  %s356_s25, 128, %s358_s28, [#allocation5]  }
 0x1c6   :  { %v347_v40 = vpop.f32.mrf.mxu2 }
 0x1c7   :  { %625 = dma.done.wait [#allocation5], 128  }
 0x1c8   :  { %626 = vsyncadd [#allocation5], 4294967168 }
 0x1c9   :  { %365 = vsyncpa [#allocation4], 1 }
 0x1ca   :  { %366 = vsyncpa [#allocation7], 1 }
 0x1cb   :  { %367 = vsyncpa [#allocation10], 1 }
 0x1cc   :  { %368 = vsyncpa [#allocation5], 1 }

</bundles_post_ra>
